<compile_context>
chip_gen: v6e
topology: v6e:2x2x1
jax: 0.10.0
libtpu: 0.0.40
codegen_flags: <defaults>
</compile_context>

<pallas_src>
import functools

import jax
import jax.numpy as jnp
from jax.experimental import pallas as pl
from jax.experimental.pallas import tpu as pltpu


def _h_swish_kernel(x_ref, o_ref):
    x = x_ref[...]
    # relu6(x + 3) = clamp(x + 3, 0, 6); trivially under the HBM roofline.
    r6 = jnp.minimum(jnp.maximum(x + 3.0, 0.0), 6.0)
    o_ref[...] = (x * r6 * (1.0 / 6.0)).astype(o_ref.dtype)


def _round_up(a, m):
    return -(-a // m) * m


def _sublane_multiple(dtype):
    # Rows per packed vreg: 8 for 4-byte, 16 for 2-byte, 32 for 1-byte dtypes.
    return 8 * max(1, 4 // jnp.dtype(dtype).itemsize)


@functools.lru_cache(maxsize=None)
def _tpu_tuning():
    """Chip-aware (target_block_bytes, vmem_limit_bytes, num_tensorcores)."""
    vmem_cap = 64 * 1024 * 1024       # conservative fallback (v7x per-TC VMEM)
    num_tc = 1
    try:
        info = pltpu.get_tpu_info()
        cap = int(getattr(info, "vmem_capacity_bytes", 0) or 0)
        if cap >= 16 * 1024 * 1024:
            vmem_cap = cap
        # Only split single-block grids if we can confidently see >1 TC.
        for name in ("num_tensorcores", "tensorcores_per_chip",
                     "num_cores_per_chip"):
            v = getattr(info, name, None)
            if isinstance(v, int) and 1 <= v <= 4:
                num_tc = v
                break
    except Exception:
        pass
    # ~8 MiB blocks on 128 MiB-VMEM chips (v5e/v6e), ~4 MiB on v7x (64 MiB).
    block = max(2 << 20, min(8 << 20, vmem_cap // 16))
    # 2 double-buffered inputs+outputs = 4x block; leave headroom but stay
    # well under every generation's physical VMEM.
    vmem_limit = int(min(max(4 * block + (16 << 20), 32 << 20),
                         vmem_cap * 7 // 8))
    return block, vmem_limit, num_tc


def _compiler_params(vmem_limit):
    return pltpu.CompilerParams(
        dimension_semantics=("parallel",),
        vmem_limit_bytes=vmem_limit,
    )


def _pick_tile_rows(rows, lanes, dtype, target_block_bytes, num_tc):
    """Rows per block: ~target_block_bytes, aligned to the dtype's packing."""
    itemsize = jnp.dtype(dtype).itemsize
    sub = _sublane_multiple(dtype)
    target = max(sub, (target_block_bytes // (lanes * itemsize)) // sub * sub)
    if rows <= target:
        # Whole array fits in one target-size block.  Only split it when this
        # chip actually has >1 TensorCore to shard the "parallel" axis onto;
        # then split into num_tc equal, packing-aligned pieces.
        if num_tc > 1 and rows >= num_tc * sub:
            return _round_up(pl.cdiv(rows, num_tc), sub)
        return rows
    return target


def _h_swish_2d(x2d, target_block_bytes, vmem_limit, num_tc, donate):
    rows, lanes = x2d.shape
    tile_rows = _pick_tile_rows(rows, lanes, x2d.dtype, target_block_bytes,
                                num_tc)
    return pl.pallas_call(
        _h_swish_kernel,
        out_shape=jax.ShapeDtypeStruct((rows, lanes), x2d.dtype),
        grid=(pl.cdiv(rows, tile_rows),),
        in_specs=[pl.BlockSpec((tile_rows, lanes), lambda i: (i, 0))],
        out_specs=pl.BlockSpec((tile_rows, lanes), lambda i: (i, 0)),
        input_output_aliases=({0: 0} if donate else {}),
        compiler_params=_compiler_params(vmem_limit),
    )(x2d)


def _h_swish_1d(flat, target_block_bytes, vmem_limit, num_tc, donate):
    """Masked 1-D kernel for element counts not divisible by 128."""
    n = flat.shape[0]
    itemsize = jnp.dtype(flat.dtype).itemsize
    # Full packed-vreg fold for rank-1 arrays: 8 * 128 * packing elements.
    granule = _sublane_multiple(flat.dtype) * 128
    if n <= granule:
        tile = n                                  # single full-extent block
    else:
        tile = max(granule,
                   (target_block_bytes // itemsize) // granule * granule)
        tile = min(tile, (n // granule) * granule)
    return pl.pallas_call(
        _h_swish_kernel,
        out_shape=jax.ShapeDtypeStruct((n,), flat.dtype),
        grid=(pl.cdiv(n, tile),),
        in_specs=[pl.BlockSpec((tile,), lambda i: (i,))],
        out_specs=pl.BlockSpec((tile,), lambda i: (i,)),
        input_output_aliases=({0: 0} if donate else {}),
        compiler_params=_compiler_params(vmem_limit),
    )(flat)


def h_swish(x, *, target_block_bytes=None, donate=False):
    """Elementwise hard-swish (x * relu6(x + 3) / 6) via Pallas on TPU.

    `donate=True` aliases the output onto the input buffer (only beneficial
    when the caller actually donates x, e.g. via jit donate_argnums).
    The PyTorch `inplace` flag has no JAX equivalent and is a no-op here.
    """
    orig_shape = x.shape
    n = x.size
    if n == 0:
        return x

    block, vmem_limit, num_tc = _tpu_tuning()
    if target_block_bytes is not None:
        block = int(target_block_bytes)

    flat = x.reshape(-1)

    # Widest lane-dense last dim (multiple of 128) dividing n exactly, so the
    # 2-D slab is a free reshape of the contiguous buffer (no pad copy).
    lanes = 0
    for cand in (1024, 512, 256, 128):
        if n % cand == 0:
            lanes = cand
            break

    if lanes:
        out2d = _h_swish_2d(flat.reshape(n // lanes, lanes), block,
                            vmem_limit, num_tc, donate)
        return out2d.reshape(orig_shape)

    # n not a multiple of 128: single masked 1-D kernel over the flat buffer
    # (Pallas masks the ragged final block) -> HBM traffic stays at 2n bytes.
    out1d = _h_swish_1d(flat, block, vmem_limit, num_tc, donate)
    return out1d.reshape(orig_shape)


if __name__ == "__main__":
    key = jax.random.PRNGKey(0)
    # NCHW input, consistent with MobileNetV3 usage.
    x = jax.random.normal(key, (2, 4, 16, 16), dtype=jnp.float32) * 4.0
    out = jax.block_until_ready(h_swish(x))
    ref = x * jnp.clip(x + 3.0, 0.0, 6.0) / 6.0
    assert out.shape == x.shape and out.dtype == x.dtype
    assert jnp.allclose(out, ref, atol=1e-6, rtol=1e-6)

    # Non-multiple-of-128 size -> masked 1-D kernel, single full-extent block.
    x2 = jax.random.normal(jax.random.PRNGKey(1), (3, 5, 7, 9),
                           dtype=jnp.float32) * 4.0
    out2 = jax.block_until_ready(h_swish(x2))
    ref2 = x2 * jnp.clip(x2 + 3.0, 0.0, 6.0) / 6.0
    assert out2.shape == x2.shape and out2.dtype == x2.dtype
    assert jnp.allclose(out2, ref2, atol=1e-6, rtol=1e-6)

    # Non-multiple-of-128 size big enough to exercise the ragged (masked)
    # final grid block of the 1-D path (1365 elements, tile = 1024).
    x3 = jax.random.normal(jax.random.PRNGKey(2), (3, 5, 7, 13),
                           dtype=jnp.float32) * 4.0
    out3 = jax.block_until_ready(h_swish(x3))
    ref3 = x3 * jnp.clip(x3 + 3.0, 0.0, 6.0) / 6.0
    assert jnp.allclose(out3, ref3, atol=1e-6, rtol=1e-6)

    # bf16 path (halves HBM traffic; 16-row packed-sublane tiling).
    x4 = jax.random.normal(jax.random.PRNGKey(3), (2, 8, 16, 16),
                           dtype=jnp.bfloat16) * 4.0
    out4 = jax.block_until_ready(h_swish(x4))
    x4f = x4.astype(jnp.float32)
    ref4 = x4f * jnp.clip(x4f + 3.0, 0.0, 6.0) / 6.0
    assert out4.dtype == jnp.bfloat16
    assert jnp.allclose(out4.astype(jnp.float32), ref4, atol=5e-2, rtol=5e-2)

    print("KERNEL_OK")
</pallas_src>

<mosaic_0001>
module attributes {stable_mosaic.version = 11 : i64} {
  func.func @_h_swish_kernel(%arg0: i32, %arg1: memref<2x1024xf32, #tpu.memory_space<vmem>>, %arg2: memref<2x1024xf32, #tpu.memory_space<vmem>>) attributes {dimension_semantics = [#tpu.dimension_semantics<parallel>], iteration_bounds = array<i64: 1>, scalar_prefetch = 0 : i64, scratch_operands = 0 : i64, tpu.core_type = #tpu.core_type<tc>, window_params = [{transform_indices = @transform_0, window_bounds = array<i64: 2, 1024>}, {transform_indices = @transform_1, window_bounds = array<i64: 2, 1024>}]} {
    %c0 = arith.constant 0 : index
    %c0_0 = arith.constant 0 : index
    %0 = vector.load %arg1[%c0, %c0_0] : memref<2x1024xf32, #tpu.memory_space<vmem>>, vector<2x1024xf32>
    %cst = arith.constant 3.000000e+00 : f32
    %1 = vector.broadcast %cst : f32 to vector<2x1024xf32>
    %2 = arith.addf %0, %1 : vector<2x1024xf32>
    %cst_1 = arith.constant 0.000000e+00 : f32
    %3 = vector.broadcast %cst_1 : f32 to vector<2x1024xf32>
    %4 = arith.maximumf %2, %3 : vector<2x1024xf32>
    %cst_2 = arith.constant 6.000000e+00 : f32
    %5 = vector.broadcast %cst_2 : f32 to vector<2x1024xf32>
    %6 = arith.minimumf %4, %5 : vector<2x1024xf32>
    %7 = arith.mulf %0, %6 : vector<2x1024xf32>
    %cst_3 = arith.constant 0.166666672 : f32
    %8 = vector.broadcast %cst_3 : f32 to vector<2x1024xf32>
    %9 = arith.mulf %7, %8 : vector<2x1024xf32>
    %c0_4 = arith.constant 0 : index
    %c0_5 = arith.constant 0 : index
    %10 = vector.load %arg2[%c0_4, %c0_5] : memref<2x1024xf32, #tpu.memory_space<vmem>>, vector<2x1024xf32>
    tpu.vector_store %arg2[%c0_4, %c0_5], %9 {strides = array<i32>} : memref<2x1024xf32, #tpu.memory_space<vmem>>, vector<2x1024xf32>,
    return
  }
  func.func @transform_0(%arg0: i32) -> (i32, i32) {
    %c0_i32 = arith.constant 0 : i32
    %c0_i32_0 = arith.constant 0 : i32
    return %arg0, %c0_i32 : i32, i32
  }
  func.func @transform_1(%arg0: i32) -> (i32, i32) {
    %c0_i32 = arith.constant 0 : i32
    %c0_i32_0 = arith.constant 0 : i32
    return %arg0, %c0_i32 : i32, i32
  }
}

</mosaic_0001>

<bundles_post_ra>
// kernel: tpu_custom_call.1
= control target key start
LH: loop header
LB: loop body
LE: loop exit
PB: predicated region body
PF: predicated region fallthrough
CT: control target
= control target key end

     0   :  { %6 = vsyncpa [#allocation3], 0  ;;  %s114_s0 = inlined_call_operand.hbm [shape: f32[2,1024], index: 0, kind: input, shape index: {}]   ;;  %s115_s1 = inlined_call_operand.hbm [shape: f32[2,1024], index: 1, kind: output, shape index: {}]  }
   0x1   :  { %7 = vsyncpa [#allocation4], 0  ;;  %s96_s6 = smov [#allocation2]  }
   0x2   :  { %s14_s7 = sshll.u32 %s96_s6, 4  ;;  %s15_s7 = int_to_ptr.vmem [resolvable:$true] %s14_s7 }
   0x3   :  { %s60_s8 = scalar_lea.vmem %s15_s7, 256  ;;  %p65_p1 = scmp.lt.s32.totalorder %s15_s7, %s15_s7 }
   0x4   :  { %p61_p0 = scmp.ne.s32.totalorder %s15_s7, %s60_s8  ;;  %p66_p2 = scmp.lt.s32.totalorder %s60_s8, %s60_s8 }
   0x6   :  { %p67_p3 = por %p66_p2, %p65_p1 }
   0x8   :  { %p68_p4 = pnand %p67_p3, %p61_p0 }
   0xa   :  { %71 = shalt.err (!%p68_p4)
}
   0xb   :  { %17 = dma.hbm_to_vmem [thread:$0]  %s114_s0, 256, %s15_s7, [#allocation3]  }
   0xc   :  { %92 = dma.done.wait [#allocation3], 256  }
   0xd   :  { %93 = vsyncadd [#allocation3], 4294967040  ;;  %v21_v0 = vld [vmem:[#allocation2] sm:$0xff]  ;;  %v22_v1 = vld [vmem:[#allocation2 + $0x8] sm:$0xff]  ;;  %s97_s11 = smov [#allocation5]  }
   0xe   :  { %v23_v2 = vadd.f32 3.0, %v21_v0  ;;  %v24_v3 = vadd.f32 3.0, %v22_v1  ;;  %s41_s12 = sshll.u32 %s97_s11, 4  ;;  %s42_s12 = int_to_ptr.vmem [resolvable:$true] %s41_s12 }
   0xf   :  { %s72_s0 = scalar_lea.vmem %s42_s12, 256  ;;  %p77_p6 = scmp.lt.s32.totalorder %s42_s12, %s42_s12 }
  0x10   :  { %v25_v4 = vmax.f32 %v23_v2, 0.0  ;;  %v26_v5 = vmax.f32 %v24_v3, 0.0  ;;  %p73_p5 = scmp.ne.s32.totalorder %s42_s12, %s72_s0  ;;  %p78_p7 = scmp.lt.s32.totalorder %s72_s0, %s72_s0 }
  0x12   :  { %v27_v6 = vmin.f32 %v25_v4, 6.0  ;;  %v28_v7 = vmin.f32 %v26_v5, 6.0  ;;  %p79_p8 = por %p78_p7, %p77_p6 }
  0x14   :  { %v29_v8 = vmul.f32 %v27_v6, %v21_v0  ;;  %v30_v9 = vmul.f32 %v28_v7, %v22_v1  ;;  %p80_p9 = pnand %p79_p8, %p73_p5 }
  0x16   :  { %v31_v10 = vmul.f32 0.16666667, %v29_v8  ;;  %v32_v11 = vmul.f32 0.16666667, %v30_v9 }
  0x18   :  { %33 = vst [vmem:[#allocation5] sm:$0xff] %v31_v10  ;;  %34 = vst [vmem:[#allocation5 + $0x8] sm:$0xff] %v32_v11 }
  0x19   :  { %83 = shalt.err (!%p80_p9)
}
  0x1a   :  { %44 = dma.vmem_to_hbm [thread:$0]  %s42_s12, 256, %s115_s1, [#allocation4]  }
  0x1b   :  { %94 = dma.done.wait [#allocation4], 256  }
  0x1c   :  { %95 = vsyncadd [#allocation4], 4294967040 }
  0x1d   :  { %48 = vsyncpa [#allocation3], 1 }
  0x1e   :  { %49 = vsyncpa [#allocation4], 1 }

</bundles_post_ra>
